<compile_context>
chip_gen: v7x
topology: tpu7x:2x2x1
jax: 0.10.0
libtpu: 0.0.40
codegen_flags: <defaults>
</compile_context>

<pallas_src>
import jax
import jax.numpy as jnp
from jax.experimental import pallas as pl
from jax.experimental.pallas import tpu as pltpu


def _embed_causal_kernel(x_ref, ctx_ref, slabs_ref, w_ref, bias_ref,
                         out_ref, nctx_ref):
    # x_ref:     (B, D_in, F, T)        raw input (used for the next_ctx update)
    # ctx_ref:   (B, D_in, F, KCTX)     previous context (only read if T < KCTX)
    # slabs_ref: (3, D_in, B*(F+2)*T)   kw-shifted, freq-padded, lane-flattened:
    #                                   slabs[kw, c, b*(F+2)*T + phi*T + t]
    #                                     = padded[b, c, phi, t + kw]
    # w_ref:     (D_out, 9*D_in)        conv weight in (kh, kw, c)-minor order
    # bias_ref:  (D_out, 1)
    # out_ref:   (B, D_out, F*T)        lane-dense NCHW-flattened conv output
    # nctx_ref:  (B, D_in, F, KCTX)     next context buffer (streaming state)
    B, D_in, F, T = x_ref.shape
    KCTX = nctx_ref.shape[-1]
    FT = F * T                 # output lanes per batch element (128 here)
    PT = (F + 2) * T           # slab lanes per batch element (incl. freq halo)

    # --- streaming state update: next_ctx = concat([ctx, x], -1)[..., -KCTX:] ---
    if T >= KCTX:
        nctx_ref[...] = x_ref[:, :, :, T - KCTX:]
    else:  # short-frame edge case (e.g. single-frame streaming, T < KCTX)
        nctx_ref[:, :, :, :KCTX - T] = ctx_ref[:, :, :, T:]
        nctx_ref[:, :, :, KCTX - T:] = x_ref[...]

    # --- build the (9*D_in, B*F*T) im2col operand in VMEM via static slices ---
    # For (kh, kw, b): the needed 128-lane chunk is slabs[kw][:, b*PT + kh*T :+ FT],
    # i.e. padded[b, :, f+kh, t+kw] flattened over (f, t). Freq halo zeros come from
    # the wrapper's pad, so no masking is required here.
    slabs = [slabs_ref[kw] for kw in range(3)]            # each (D_in, B*PT)
    pieces = []
    for kh in range(3):                                    # (kh, kw) major order ...
        for kw in range(3):                                # ... matches w_ref layout
            s = slabs[kw]
            blk = [s[:, b * PT + kh * T: b * PT + kh * T + FT] for b in range(B)]
            pieces.append(blk[0] if B == 1 else jnp.concatenate(blk, axis=1))
    xcol = jnp.concatenate(pieces, axis=0)                 # (9*D_in, B*F*T)

    # --- single MXU contraction (K=72, N=B*F*T) + one bias add ---
    acc = jax.lax.dot_general(
        w_ref[...], xcol,
        dimension_numbers=(((1,), (0,)), ((), ())),
        preferred_element_type=jnp.float32)                # (D_out, B*F*T)
    acc = acc + bias_ref[...]

    # lane-dense, 128-aligned, unmasked stores (NCHW-flattened output layout)
    for b in range(B):
        out_ref[b] = acc[:, b * FT:(b + 1) * FT].astype(out_ref.dtype)


def _embed_causal_pallas(x, ctx_buf, slabs, w2, bias2):
    B, D_in, F, T = x.shape
    KCTX = ctx_buf.shape[-1]
    D_out = w2.shape[0]
    return pl.pallas_call(
        _embed_causal_kernel,
        out_shape=(
            jax.ShapeDtypeStruct((B, D_out, F * T), x.dtype),      # conv output
            jax.ShapeDtypeStruct((B, D_in, F, KCTX), x.dtype),     # next ctx_buf
        ),
        grid=(1,),  # whole problem (~40 KB) resident in VMEM; no per-step overhead
        in_specs=[
            pl.BlockSpec(x.shape, lambda i: (0, 0, 0, 0)),
            pl.BlockSpec(ctx_buf.shape, lambda i: (0, 0, 0, 0)),
            pl.BlockSpec(slabs.shape, lambda i: (0, 0, 0)),
            pl.BlockSpec(w2.shape, lambda i: (0, 0)),
            pl.BlockSpec(bias2.shape, lambda i: (0, 0)),
        ],
        out_specs=(
            pl.BlockSpec((B, D_out, F * T), lambda i: (0, 0, 0)),
            pl.BlockSpec((B, D_in, F, KCTX), lambda i: (0, 0, 0, 0)),
        ),
        compiler_params=pltpu.CompilerParams(
            dimension_semantics=("arbitrary",)),
    )(x, ctx_buf, slabs, w2, bias2)


def prepare_conv_params(weight_oihw, bias):
    """Module-init-time prep (done ONCE, not per forward call).

    weight_oihw: (D_out, D_in, 3, 3) PyTorch Conv2d layout
    bias:        (D_out,)
    Returns w2 (D_out, 9*D_in) in (kh, kw, c)-minor order and bias2 (D_out, 1).
    """
    D_out, D_in, KH, KW = weight_oihw.shape
    w2 = jnp.transpose(weight_oihw, (0, 2, 3, 1)).reshape(D_out, KH * KW * D_in)
    bias2 = bias.reshape(D_out, 1)
    return w2, bias2


@jax.jit
def embed_causal_forward(x, ctx_buf, w2, bias2):
    """Matches Embed_Causal.forward.

    x:       (B, D_in, freq, T)     NCHW
    ctx_buf: (B, D_in, freq, 2)
    w2:      (D_out, 9*D_in)        from prepare_conv_params (init-time)
    bias2:   (D_out, 1)
    Returns (output (B, D_out, freq, T), next_ctx_buf (B, D_in, freq, 2)).
    """
    B, D_in, F, T = x.shape
    D_out = w2.shape[0]

    # Tiny fused relayout prologue (one small XLA fusion, ~27 KB written):
    # the three kw-shifted, freq-padded slabs with the (F, T) plane flattened onto
    # the lane axis and B merged onto lanes as well.
    # TODO(synk): fold this relayout into the kernel once Mosaic minor-dim
    #             ((F, T) -> F*T) reshapes are reliably lowered.
    cat = jnp.concatenate([ctx_buf, x], axis=-1)                 # (B, D_in, F, T+2)
    padded = jnp.pad(cat, ((0, 0), (0, 0), (1, 1), (0, 0)))      # (B, D_in, F+2, T+2)
    slabs = jnp.stack([padded[..., kw:kw + T] for kw in range(3)], axis=0)
    slabs = slabs.transpose(0, 2, 1, 3, 4).reshape(3, D_in, B * (F + 2) * T)

    out_flat, next_ctx = _embed_causal_pallas(x, ctx_buf, slabs, w2, bias2)
    out = out_flat.reshape(B, D_out, F, T)   # contiguous split: free reshape
    return out, next_ctx


if __name__ == "__main__":
    # Shapes consistent with the module: Embed_Causal(D_in=8, D_out=16, freq=16)
    B, D_in, D_out, FREQ, T, K = 2, 8, 16, 16, 8, 3

    key = jax.random.PRNGKey(0)
    k1, k2, k3, k4 = jax.random.split(key, 4)

    # Deterministic synthetic parameters (PyTorch-style uniform init).
    fan_in = D_in * 3 * 3
    bound = 1.0 / jnp.sqrt(fan_in)
    weight = jax.random.uniform(k1, (D_out, D_in, 3, 3), jnp.float32, -bound, bound)
    bias = jax.random.uniform(k2, (D_out,), jnp.float32, -bound, bound)

    x = jax.random.normal(k3, (B, D_in, FREQ, T), jnp.float32)
    # init_buffers gives zeros; make the state non-trivial to exercise the halo path.
    ctx_buf = 0.1 * jax.random.normal(k4, (B, D_in, FREQ, K - 1), jnp.float32)

    # init-time parameter prep (hoisted out of the per-call path, per review)
    w2, bias2 = prepare_conv_params(weight, bias)

    out, next_ctx = embed_causal_forward(x, ctx_buf, w2, bias2)
    out = jax.block_until_ready(out)
    next_ctx = jax.block_until_ready(next_ctx)

    # Reference check against XLA's conv (same semantics as PyTorch Conv2d).
    cat = jnp.concatenate([ctx_buf, x], axis=-1)
    padded = jnp.pad(cat, ((0, 0), (0, 0), (1, 1), (0, 0)))
    ref = jax.lax.conv_general_dilated(
        padded, weight, window_strides=(1, 1), padding="VALID",
        dimension_numbers=("NCHW", "OIHW", "NCHW")) + bias[None, :, None, None]
    ref_ctx = cat[..., -(K - 1):]

    assert out.shape == (B, D_out, FREQ, T)
    assert next_ctx.shape == (B, D_in, FREQ, K - 1)
    assert jnp.allclose(out, ref, atol=1e-4, rtol=1e-4), \
        float(jnp.max(jnp.abs(out - ref)))
    assert jnp.allclose(next_ctx, ref_ctx)

    print("KERNEL_OK")
</pallas_src>

<mosaic_0001>
module attributes {stable_mosaic.version = 11 : i64} {
  func.func @_embed_causal_kernel(%arg0: i32, %arg1: memref<2x8x16x8xf32, #tpu.memory_space<vmem>>, %arg2: memref<2x8x16x2xf32, #tpu.memory_space<vmem>>, %arg3: memref<3x8x288xf32, #tpu.memory_space<vmem>>, %arg4: memref<16x72xf32, #tpu.memory_space<vmem>>, %arg5: memref<16x1xf32, #tpu.memory_space<vmem>>, %arg6: memref<2x16x128xf32, #tpu.memory_space<vmem>>, %arg7: memref<2x8x16x2xf32, #tpu.memory_space<vmem>>) attributes {dimension_semantics = [#tpu.dimension_semantics<arbitrary>], iteration_bounds = array<i64: 1>, scalar_prefetch = 0 : i64, scratch_operands = 0 : i64, tpu.core_type = #tpu.core_type<tc>, window_params = [{pipeline_mode = #tpu.pipeline_mode<synchronous>, transform_indices = @transform_0, window_bounds = array<i64: 2, 8, 16, 8>}, {pipeline_mode = #tpu.pipeline_mode<synchronous>, transform_indices = @transform_1, window_bounds = array<i64: 2, 8, 16, 2>}, {pipeline_mode = #tpu.pipeline_mode<synchronous>, transform_indices = @transform_2, window_bounds = array<i64: 3, 8, 288>}, {pipeline_mode = #tpu.pipeline_mode<synchronous>, transform_indices = @transform_3, window_bounds = array<i64: 16, 72>}, {pipeline_mode = #tpu.pipeline_mode<synchronous>, transform_indices = @transform_4, window_bounds = array<i64: 16, 1>}, {pipeline_mode = #tpu.pipeline_mode<synchronous>, transform_indices = @transform_5, window_bounds = array<i64: 2, 16, 128>}, {pipeline_mode = #tpu.pipeline_mode<synchronous>, transform_indices = @transform_6, window_bounds = array<i64: 2, 8, 16, 2>}]} {
    %c0 = arith.constant 0 : index
    %c0_0 = arith.constant 0 : index
    %c0_1 = arith.constant 0 : index
    %c6 = arith.constant 6 : index
    %0 = vector.load %arg1[%c0, %c0_0, %c0_1, %c6] : memref<2x8x16x8xf32, #tpu.memory_space<vmem>>, vector<2x8x16x2xf32>
    %c0_2 = arith.constant 0 : index
    %c0_3 = arith.constant 0 : index
    %c0_4 = arith.constant 0 : index
    %c0_5 = arith.constant 0 : index
    %1 = vector.load %arg7[%c0_2, %c0_3, %c0_4, %c0_5] : memref<2x8x16x2xf32, #tpu.memory_space<vmem>>, vector<2x8x16x2xf32>
    tpu.vector_store %arg7[%c0_2, %c0_3, %c0_4, %c0_5], %0 {strides = array<i32>} : memref<2x8x16x2xf32, #tpu.memory_space<vmem>>, vector<2x8x16x2xf32>,
    %c0_6 = arith.constant 0 : index
    %c0_7 = arith.constant 0 : index
    %c0_8 = arith.constant 0 : index
    %2 = vector.load %arg3[%c0_6, %c0_7, %c0_8] : memref<3x8x288xf32, #tpu.memory_space<vmem>>, vector<1x8x288xf32>
    %3 = vector.shape_cast %2 : vector<1x8x288xf32> to vector<8x288xf32>
    %c1 = arith.constant 1 : index
    %c0_9 = arith.constant 0 : index
    %c0_10 = arith.constant 0 : index
    %4 = vector.load %arg3[%c1, %c0_9, %c0_10] : memref<3x8x288xf32, #tpu.memory_space<vmem>>, vector<1x8x288xf32>
    %5 = vector.shape_cast %4 : vector<1x8x288xf32> to vector<8x288xf32>
    %c2 = arith.constant 2 : index
    %c0_11 = arith.constant 0 : index
    %c0_12 = arith.constant 0 : index
    %6 = vector.load %arg3[%c2, %c0_11, %c0_12] : memref<3x8x288xf32, #tpu.memory_space<vmem>>, vector<1x8x288xf32>
    %7 = vector.shape_cast %6 : vector<1x8x288xf32> to vector<8x288xf32>
    %8 = vector.extract_strided_slice %3 {offsets = [0, 0], sizes = [8, 128], strides = [1, 1]} : vector<8x288xf32> to vector<8x128xf32>
    %9 = vector.extract_strided_slice %3 {offsets = [0, 144], sizes = [8, 128], strides = [1, 1]} : vector<8x288xf32> to vector<8x128xf32>
    %10 = tpu.concatenate %8, %9 in 1 : vector<8x128xf32>, vector<8x128xf32> -> vector<8x256xf32>
    %11 = vector.extract_strided_slice %5 {offsets = [0, 0], sizes = [8, 128], strides = [1, 1]} : vector<8x288xf32> to vector<8x128xf32>
    %12 = vector.extract_strided_slice %5 {offsets = [0, 144], sizes = [8, 128], strides = [1, 1]} : vector<8x288xf32> to vector<8x128xf32>
    %13 = tpu.concatenate %11, %12 in 1 : vector<8x128xf32>, vector<8x128xf32> -> vector<8x256xf32>
    %14 = vector.extract_strided_slice %7 {offsets = [0, 0], sizes = [8, 128], strides = [1, 1]} : vector<8x288xf32> to vector<8x128xf32>
    %15 = vector.extract_strided_slice %7 {offsets = [0, 144], sizes = [8, 128], strides = [1, 1]} : vector<8x288xf32> to vector<8x128xf32>
    %16 = tpu.concatenate %14, %15 in 1 : vector<8x128xf32>, vector<8x128xf32> -> vector<8x256xf32>
    %17 = vector.extract_strided_slice %3 {offsets = [0, 8], sizes = [8, 128], strides = [1, 1]} : vector<8x288xf32> to vector<8x128xf32>
    %18 = vector.extract_strided_slice %3 {offsets = [0, 152], sizes = [8, 128], strides = [1, 1]} : vector<8x288xf32> to vector<8x128xf32>
    %19 = tpu.concatenate %17, %18 in 1 : vector<8x128xf32>, vector<8x128xf32> -> vector<8x256xf32>
    %20 = vector.extract_strided_slice %5 {offsets = [0, 8], sizes = [8, 128], strides = [1, 1]} : vector<8x288xf32> to vector<8x128xf32>
    %21 = vector.extract_strided_slice %5 {offsets = [0, 152], sizes = [8, 128], strides = [1, 1]} : vector<8x288xf32> to vector<8x128xf32>
    %22 = tpu.concatenate %20, %21 in 1 : vector<8x128xf32>, vector<8x128xf32> -> vector<8x256xf32>
    %23 = vector.extract_strided_slice %7 {offsets = [0, 8], sizes = [8, 128], strides = [1, 1]} : vector<8x288xf32> to vector<8x128xf32>
    %24 = vector.extract_strided_slice %7 {offsets = [0, 152], sizes = [8, 128], strides = [1, 1]} : vector<8x288xf32> to vector<8x128xf32>
    %25 = tpu.concatenate %23, %24 in 1 : vector<8x128xf32>, vector<8x128xf32> -> vector<8x256xf32>
    %26 = vector.extract_strided_slice %3 {offsets = [0, 16], sizes = [8, 128], strides = [1, 1]} : vector<8x288xf32> to vector<8x128xf32>
    %27 = vector.extract_strided_slice %3 {offsets = [0, 160], sizes = [8, 128], strides = [1, 1]} : vector<8x288xf32> to vector<8x128xf32>
    %28 = tpu.concatenate %26, %27 in 1 : vector<8x128xf32>, vector<8x128xf32> -> vector<8x256xf32>
    %29 = vector.extract_strided_slice %5 {offsets = [0, 16], sizes = [8, 128], strides = [1, 1]} : vector<8x288xf32> to vector<8x128xf32>
    %30 = vector.extract_strided_slice %5 {offsets = [0, 160], sizes = [8, 128], strides = [1, 1]} : vector<8x288xf32> to vector<8x128xf32>
    %31 = tpu.concatenate %29, %30 in 1 : vector<8x128xf32>, vector<8x128xf32> -> vector<8x256xf32>
    %32 = vector.extract_strided_slice %7 {offsets = [0, 16], sizes = [8, 128], strides = [1, 1]} : vector<8x288xf32> to vector<8x128xf32>
    %33 = vector.extract_strided_slice %7 {offsets = [0, 160], sizes = [8, 128], strides = [1, 1]} : vector<8x288xf32> to vector<8x128xf32>
    %34 = tpu.concatenate %32, %33 in 1 : vector<8x128xf32>, vector<8x128xf32> -> vector<8x256xf32>
    %35 = tpu.concatenate %10, %13, %16, %19, %22, %25, %28, %31, %34 in 0 : vector<8x256xf32>, vector<8x256xf32>, vector<8x256xf32>, vector<8x256xf32>, vector<8x256xf32>, vector<8x256xf32>, vector<8x256xf32>, vector<8x256xf32>, vector<8x256xf32> -> vector<72x256xf32>
    %c0_13 = arith.constant 0 : index
    %c0_14 = arith.constant 0 : index
    %36 = vector.load %arg4[%c0_13, %c0_14] : memref<16x72xf32, #tpu.memory_space<vmem>>, vector<16x72xf32>
    %cst = arith.constant dense<0.000000e+00> : vector<16x256xf32>
    %37 = tpu.matmul %36, %35, %cst {dimension_numbers = #tpu.dot_dimension_numbers<[1], [0], [0], [1], [0, 0, 1, 1], [], []>} : vector<16x72xf32>, vector<72x256xf32>, vector<16x256xf32> -> vector<16x256xf32>
    %c0_15 = arith.constant 0 : index
    %c0_16 = arith.constant 0 : index
    %38 = vector.load %arg5[%c0_15, %c0_16] : memref<16x1xf32, #tpu.memory_space<vmem>>, vector<16x1xf32>
    %39 = vector.broadcast %38 : vector<16x1xf32> to vector<16x256xf32>
    %40 = arith.addf %37, %39 : vector<16x256xf32>
    %41 = vector.extract_strided_slice %40 {offsets = [0, 0], sizes = [16, 128], strides = [1, 1]} : vector<16x256xf32> to vector<16x128xf32>
    %c0_17 = arith.constant 0 : index
    %c0_18 = arith.constant 0 : index
    %c0_19 = arith.constant 0 : index
    %42 = vector.load %arg6[%c0_17, %c0_18, %c0_19] : memref<2x16x128xf32, #tpu.memory_space<vmem>>, vector<1x16x128xf32>
    %43 = vector.shape_cast %42 : vector<1x16x128xf32> to vector<16x128xf32>
    %44 = vector.shape_cast %41 : vector<16x128xf32> to vector<1x16x128xf32>
    tpu.vector_store %arg6[%c0_17, %c0_18, %c0_19], %44 {strides = array<i32>} : memref<2x16x128xf32, #tpu.memory_space<vmem>>, vector<1x16x128xf32>,
    %45 = vector.extract_strided_slice %40 {offsets = [0, 128], sizes = [16, 128], strides = [1, 1]} : vector<16x256xf32> to vector<16x128xf32>
    %c1_20 = arith.constant 1 : index
    %c0_21 = arith.constant 0 : index
    %c0_22 = arith.constant 0 : index
    %46 = vector.load %arg6[%c1_20, %c0_21, %c0_22] : memref<2x16x128xf32, #tpu.memory_space<vmem>>, vector<1x16x128xf32>
    %47 = vector.shape_cast %46 : vector<1x16x128xf32> to vector<16x128xf32>
    %48 = vector.shape_cast %45 : vector<16x128xf32> to vector<1x16x128xf32>
    tpu.vector_store %arg6[%c1_20, %c0_21, %c0_22], %48 {strides = array<i32>} : memref<2x16x128xf32, #tpu.memory_space<vmem>>, vector<1x16x128xf32>,
    return
  }
  func.func @transform_0(%arg0: i32) -> (i32, i32, i32, i32) {
    %c0_i32 = arith.constant 0 : i32
    %c0_i32_0 = arith.constant 0 : i32
    %c0_i32_1 = arith.constant 0 : i32
    %c0_i32_2 = arith.constant 0 : i32
    %c0_i32_3 = arith.constant 0 : i32
    return %c0_i32, %c0_i32_0, %c0_i32_1, %c0_i32_2 : i32, i32, i32, i32
  }
  func.func @transform_1(%arg0: i32) -> (i32, i32, i32, i32) {
    %c0_i32 = arith.constant 0 : i32
    %c0_i32_0 = arith.constant 0 : i32
    %c0_i32_1 = arith.constant 0 : i32
    %c0_i32_2 = arith.constant 0 : i32
    %c0_i32_3 = arith.constant 0 : i32
    return %c0_i32, %c0_i32_0, %c0_i32_1, %c0_i32_2 : i32, i32, i32, i32
  }
  func.func @transform_2(%arg0: i32) -> (i32, i32, i32) {
    %c0_i32 = arith.constant 0 : i32
    %c0_i32_0 = arith.constant 0 : i32
    %c0_i32_1 = arith.constant 0 : i32
    %c0_i32_2 = arith.constant 0 : i32
    return %c0_i32, %c0_i32_0, %c0_i32_1 : i32, i32, i32
  }
  func.func @transform_3(%arg0: i32) -> (i32, i32) {
    %c0_i32 = arith.constant 0 : i32
    %c0_i32_0 = arith.constant 0 : i32
    %c0_i32_1 = arith.constant 0 : i32
    return %c0_i32, %c0_i32_0 : i32, i32
  }
  func.func @transform_4(%arg0: i32) -> (i32, i32) {
    %c0_i32 = arith.constant 0 : i32
    %c0_i32_0 = arith.constant 0 : i32
    %c0_i32_1 = arith.constant 0 : i32
    return %c0_i32, %c0_i32_0 : i32, i32
  }
  func.func @transform_5(%arg0: i32) -> (i32, i32, i32) {
    %c0_i32 = arith.constant 0 : i32
    %c0_i32_0 = arith.constant 0 : i32
    %c0_i32_1 = arith.constant 0 : i32
    %c0_i32_2 = arith.constant 0 : i32
    return %c0_i32, %c0_i32_0, %c0_i32_1 : i32, i32, i32
  }
  func.func @transform_6(%arg0: i32) -> (i32, i32, i32, i32) {
    %c0_i32 = arith.constant 0 : i32
    %c0_i32_0 = arith.constant 0 : i32
    %c0_i32_1 = arith.constant 0 : i32
    %c0_i32_2 = arith.constant 0 : i32
    %c0_i32_3 = arith.constant 0 : i32
    return %c0_i32, %c0_i32_0, %c0_i32_1, %c0_i32_2 : i32, i32, i32, i32
  }
}

</mosaic_0001>

<bundles_post_ra>
// kernel: embed_causal_forward.1
= control target key start
LH: loop header
LB: loop body
LE: loop exit
PB: predicated region body
PF: predicated region fallthrough
CT: control target
= control target key end

     0   :  { %s534_s26 = smov 112   ;;  %s535_s13 = smov 120   ;;  %v538_v17 = vmov 0.0   ;;  %v539_v18 = vmov 0   ;;  %vm232_vm0 = vcmask 916480   ;;  %vm256_vm1 = vcmask 982016   ;;  %s941_s2 = inlined_call_operand.vmem [shape: f32[3,8,288], index: 2, kind: input, shape index: {}]   ;;  %s942_s1 = inlined_call_operand.vmem [shape: f32[2,8,16,2], index: 1, kind: input, shape index: {}]   ;;  %s943_s0 = inlined_call_operand.vmem [shape: f32[2,8,16,8], index: 0, kind: input, shape index: {}]   ;;  %s944_s4 = inlined_call_operand.vmem [shape: f32[16,1], index: 4, kind: input, shape index: {}]   ;;  %s945_s6 = inlined_call_operand.vmem [shape: f32[2,8,16,2], index: 6, kind: output, shape index: {1}]   ;;  %s946_s3 = inlined_call_operand.vmem [shape: f32[16,72], index: 3, kind: input, shape index: {}]   ;;  %s947_s5 = inlined_call_operand.vmem [shape: f32[2,16,128], index: 5, kind: output, shape index: {0}]  }
   0x1   :  { %v438_v0 = vld [vmem:[%s941_s2 + $0x38] sm:$0xff]  ;;  %v216_v1 = vld [vmem:[%s941_s2 + $0x8] sm:$0xff]  ;;  %v217_v2 = vld [vmem:[%s941_s2 + $0x10] sm:$0xff]  ;;  %s536_s16 = smov 104   ;;  %s537_s17 = smov 96   ;;  %408 = vmatprep.mubr.f32.mxu0 %v538_v17  ;;  %414 = vmatprep.mubr.f32.mxu1 %v538_v17  ;;  %vm263_vm2 = vcmask 850944  }
   0x2   :  { %245 = vrot.lane.b32.xlu1 %v438_v0, %s534_s26  ;;  %v477_v3 = vpack.i.bf16 %v217_v2, %v216_v1  ;;  %v435_v4 = vld [vmem:[%s941_s2 + $0x20] sm:$0xff]  ;;  %v436_v5 = vld [vmem:[%s941_s2 + $0x28] sm:$0xff]  ;;  %v434_v9 = vld [vmem:[%s941_s2 + $0x18] sm:$0xff]  ;;  %533 = vset.pattern.permute.xlu0 %v539_v18  ;;  %s540_s21 = smov 122   ;;  %vm300_vm3 = vcmask 785408   ;;  %vm182_vm4 = vcmask 15360  }
   0x3   :  { %v439_v6 = vld [vmem:[%s941_s2 + $0x40] sm:$0xff]  ;;  %v482_v8 = vpack.i.bf16 %v436_v5, %v435_v4  ;;  %v609_v13 = vld [vmem:[%s941_s2 + $0x30] sm:$0xff]  ;;  %v507_v15 = vpack.i.bf16 %v435_v4, %v434_v9  ;;  %532 = vset.pattern.permute.xlu1 %v539_v18  ;;  %v23_v19 = vld [vmem:[%s943_s0 + $0x8] sm:$0xff]  ;;  %vm337_vm5 = vcmask 588800  }
   0x4   :  { %v215_v7 = vld [vmem:[%s941_s2] sm:$0xff]  ;;  %478 = vrot.lane.b32.xlu0 %v477_v3, %s534_s26  ;;  %v502_v12 = vpack.i.bf16 %v439_v6, %v438_v0  ;;  %v512_v14 = vpack.i.bf16 %v438_v0, %v609_v13  ;;  %v24_v22 = vld [vmem:[%s943_s0 + $0x10] sm:$0xff]  ;;  %v25_v23 = vld [vmem:[%s943_s0 + $0x18] sm:$0xff] }
   0x5   :  { %v602_v10 = vpack.c.bf16 %v434_v9, %v215_v7  ;;  %v492_v11 = vpack.i.bf16 %v216_v1, %v215_v7  ;;  %v527_v16 = vpack.i.bf16 %v434_v9, %v215_v7  ;;  %v22_v20 = vld [vmem:[%s943_s0] sm:$0xff]  ;;  %v326_v24 = vld [vmem:[%s944_s4 + $0x8] sm:$0xff]  ;;  %v28_v27 = vld [vmem:[%s943_s0 + $0x30] sm:$0xff] }
   0x6   :  { %247 = vrot.lane.b32.xlu1 %v439_v6, %s534_s26  ;;  %v325_v21 = vld [vmem:[%s944_s4] sm:$0xff]  ;;  %v27_v26 = vld [vmem:[%s943_s0 + $0x28] sm:$0xff]  ;;  %v29_v28 = vld [vmem:[%s943_s0 + $0x38] sm:$0xff] }
   0x7   :  { %v26_v25 = vld [vmem:[%s943_s0 + $0x20] sm:$0xff]  ;;  %v31_v30 = vld [vmem:[%s943_s0 + $0x48] sm:$0xff]  ;;  %v32_v31 = vld [vmem:[%s943_s0 + $0x50] sm:$0xff] }
   0x8   :  { %483 = vrot.lane.b32.xlu0 %v482_v8, %s534_s26  ;;  %v30_v29 = vld [vmem:[%s943_s0 + $0x40] sm:$0xff]  ;;  %v33_v32 = vld [vmem:[%s943_s0 + $0x58] sm:$0xff]  ;;  %v35_v34 = vld [vmem:[%s943_s0 + $0x68] sm:$0xff] }
   0x9   :  { %v34_v33 = vld [vmem:[%s943_s0 + $0x60] sm:$0xff]  ;;  %v36_v35 = vld [vmem:[%s943_s0 + $0x70] sm:$0xff]  ;;  %v37_v36 = vld [vmem:[%s943_s0 + $0x78] sm:$0xff] }
   0xa   :  { %493 = vrot.lane.b32.xlu1 %v492_v11, %s535_s13  ;;  %v38_v37 = vld [vmem:[%s943_s0 + $0x80] sm:$0xff]  ;;  %v39_v38 = vld [vmem:[%s943_s0 + $0x88] sm:$0xff]  ;;  %v40_v39 = vld [vmem:[%s943_s0 + $0x90] sm:$0xff] }
   0xb   :  { %v41_v40 = vld [vmem:[%s943_s0 + $0x98] sm:$0xff]  ;;  %v42_v41 = vld [vmem:[%s943_s0 + $0xa0] sm:$0xff]  ;;  %v43_v42 = vld [vmem:[%s943_s0 + $0xa8] sm:$0xff] }
   0xc   :  { %488 = vrot.lane.b32.xlu0 %v477_v3, %s536_s16  ;;  %v44_v43 = vld [vmem:[%s943_s0 + $0xb0] sm:$0xff]  ;;  %v45_v44 = vld [vmem:[%s943_s0 + $0xb8] sm:$0xff]  ;;  %v46_v45 = vld [vmem:[%s943_s0 + $0xc0] sm:$0xff] }
   0xd   :  { %v47_v46 = vld [vmem:[%s943_s0 + $0xc8] sm:$0xff]  ;;  %v48_v47 = vld [vmem:[%s943_s0 + $0xd0] sm:$0xff]  ;;  %v49_v48 = vld [vmem:[%s943_s0 + $0xd8] sm:$0xff] }
   0xe   :  { %503 = vrot.lane.b32.xlu1 %v502_v12, %s536_s16  ;;  %v50_v49 = vld [vmem:[%s943_s0 + $0xe0] sm:$0xff]  ;;  %v51_v50 = vld [vmem:[%s943_s0 + $0xe8] sm:$0xff]  ;;  %v52_v51 = vld [vmem:[%s943_s0 + $0xf0] sm:$0xff] }
   0xf   :  { %v53_v52 = vld [vmem:[%s943_s0 + $0xf8] sm:$0xff] }
  0x10   :  { %498 = vrot.lane.b32.xlu0 %v482_v8, %s536_s16 }
  0x12   :  { %513 = vrot.lane.b32.xlu1 %v512_v14, %s535_s13 }
  0x14   :  { %508 = vrot.lane.b32.xlu0 %v507_v15, %s535_s13 }
  0x16   :  { %523 = vrot.lane.b32.xlu1 %v482_v8, %s537_s17 }
  0x18   :  { %518 = vrot.lane.b32.xlu0 %v477_v3, %s537_s17 }
  0x1a   :  { %317 = vrot.lane.b32.xlu1 %v438_v0, %s537_s17 }
  0x1c   :  { %528 = vrot.lane.b32.xlu0 %v527_v16, %s534_s26 }
  0x1e   :  { %313 = vrot.lane.b32.xlu1 %v609_v13, %s534_s26 }
  0x20   :  { %319 = vrot.lane.b32.xlu0 %v439_v6, %s537_s17 }
  0x22   :  { %88 = vrot.lane.b32.xlu1 %v23_v19, %s540_s21 }
  0x24   :  { %86 = vrot.lane.b32.xlu0 %v22_v20, %s540_s21 }
  0x26   :  { %329 = vperm.xlu1 %532, %v325_v21  }
  0x28   :  { %90 = vrot.lane.b32.xlu0 %v24_v22, %s540_s21 }
  0x2a   :  { %92 = vrot.lane.b32.xlu1 %v25_v23, %s540_s21 }
  0x2c   :  { %334 = vperm.xlu0 %533, %v326_v24  }
  0x2e   :  { %94 = vrot.lane.b32.xlu1 %v26_v25, %s540_s21 }
  0x30   :  { %96 = vrot.lane.b32.xlu0 %v27_v26, %s540_s21 }
  0x32   :  { %98 = vrot.lane.b32.xlu1 %v28_v27, %s540_s21 }
  0x34   :  { %100 = vrot.lane.b32.xlu0 %v29_v28, %s540_s21 }
  0x36   :  { %102 = vrot.lane.b32.xlu1 %v30_v29, %s540_s21 }
  0x38   :  { %104 = vrot.lane.b32.xlu0 %v31_v30, %s540_s21 }
  0x3a   :  { %106 = vrot.lane.b32.xlu1 %v32_v31, %s540_s21 }
  0x3c   :  { %108 = vrot.lane.b32.xlu0 %v33_v32, %s540_s21 }
  0x3e   :  { %110 = vrot.lane.b32.xlu1 %v34_v33, %s540_s21 }
  0x40   :  { %112 = vrot.lane.b32.xlu0 %v35_v34, %s540_s21 }
  0x42   :  { %114 = vrot.lane.b32.xlu1 %v36_v35, %s540_s21 }
  0x44   :  { %116 = vrot.lane.b32.xlu0 %v37_v36, %s540_s21 }
  0x46   :  { %118 = vrot.lane.b32.xlu1 %v38_v37, %s540_s21 }
  0x48   :  { %120 = vrot.lane.b32.xlu0 %v39_v38, %s540_s21 }
  0x4a   :  { %122 = vrot.lane.b32.xlu1 %v40_v39, %s540_s21 }
  0x4c   :  { %124 = vrot.lane.b32.xlu0 %v41_v40, %s540_s21 }
  0x4e   :  { %126 = vrot.lane.b32.xlu1 %v42_v41, %s540_s21 }
  0x50   :  { %128 = vrot.lane.b32.xlu0 %v43_v42, %s540_s21 }
  0x52   :  { %130 = vrot.lane.b32.xlu1 %v44_v43, %s540_s21 }
  0x54   :  { %132 = vrot.lane.b32.xlu0 %v45_v44, %s540_s21 }
  0x56   :  { %134 = vrot.lane.b32.xlu1 %v46_v45, %s540_s21 }
  0x58   :  { %136 = vrot.lane.b32.xlu0 %v47_v46, %s540_s21 }
  0x5a   :  { %138 = vrot.lane.b32.xlu1 %v48_v47, %s540_s21 }
  0x5c   :  { %140 = vrot.lane.b32.xlu0 %v49_v48, %s540_s21 }
  0x5e   :  { %142 = vrot.lane.b32.xlu1 %v50_v49, %s540_s21  ;;  %v323_v49 = vld [vmem:[%s946_s3] sm:$0xff] }
  0x60   :  { %144 = vrot.lane.b32.xlu0 %v51_v50, %s540_s21  ;;  %v324_v50 = vld [vmem:[%s946_s3 + $0x8] sm:$0xff] }
  0x62   :  { %146 = vrot.lane.b32.xlu1 %v52_v51, %s540_s21 }
  0x64   :  { %148 = vrot.lane.b32.xlu0 %v53_v52, %s540_s21 }
  0x74   :  { %v749_v53 = vpop.permute.xlu1 %245 }
  0x76   :  { %v751_v54 = vpop.permute.xlu0 %478 }
  0x77   :  { %v481_v56 = vunpack.i.h.bf16 %v751_v54  ;;  %v480_v57 = vunpack.i.l.bf16 %v751_v54 }
  0x78   :  { %v248_v55 = vpop.permute.xlu1 %247 }
  0x79   :  { %v233_v0 = vsel %vm232_vm0, %v480_v57, %v481_v56  ;;  %v249_v7 = vsel %vm232_vm0, %v749_v53, %v248_v55 }
  0x7a   :  { %v755_v58 = vpop.permute.xlu0 %483 }
  0x7b   :  { %v486_v59 = vunpack.i.h.bf16 %v755_v58  ;;  %v485_v60 = vunpack.i.l.bf16 %v755_v58 }
  0x7c   :  { %v494_v61 = vpop.permute.xlu1 %493 }
  0x7d   :  { %v496_v62 = vunpack.i.h.bf16 %v494_v61  ;;  %v495_v63 = vunpack.i.l.bf16 %v494_v61  ;;  %v241_v1 = vsel %vm232_vm0, %v485_v60, %v486_v59 }
  0x7e   :  { %v489_v2 = vpop.permute.xlu0 %488  ;;  %v444_v3 = vpack.c.bf16 %v241_v1, %v233_v0 }
  0x7f   :  { %v491_v4 = vunpack.i.h.bf16 %v489_v2  ;;  %v490_v5 = vunpack.i.l.bf16 %v489_v2  ;;  %v257_v6 = vsel %vm256_vm1, %v495_v63, %v496_v62 }
  0x80   :  { %445 = vmatprep.subr.bf16.mxu0 %v444_v3  ;;  %460 = vmatprep.subr.bf16.mxu1 %v444_v3  ;;  %v504_v8 = vpop.permute.xlu1 %503  ;;  %v450_v14 = vpack.c.bf16 %v257_v6, %v609_v13 }
  0x81   :  { %v506_v9 = vunpack.i.h.bf16 %v504_v8  ;;  %v505_v11 = vunpack.i.l.bf16 %v504_v8  ;;  %447 = vmatpush1.bf16.msra.mxu0 %v602_v10  ;;  %465 = vmatpush1.bf16.msra.mxu1 %v602_v10  ;;  %v264_v12 = vsel %vm263_vm2, %v490_v5, %v491_v4 }
  0x82   :  { %v499_v15 = vpop.permute.xlu0 %498  ;;  %v448_v16 = vpack.c.bf16 %v264_v12, %v249_v7 }
  0x83   :  { %v501_v17 = vunpack.i.h.bf16 %v499_v15  ;;  %v500_v18 = vunpack.i.l.bf16 %v499_v15  ;;  %v290_v19 = vsel %vm263_vm2, %v505_v11, %v506_v9 }
  0x84   :  { %v514_v20 = vpop.permute.xlu1 %513  ;;  %449 = vmatprep.subr.bf16.mxu0 %v448_v16  ;;  %461 = vmatprep.subr.bf16.mxu1 %v448_v16 }
  0x85   :  { %v516_v21 = vunpack.i.h.bf16 %v514_v20  ;;  %v515_v22 = vunpack.i.l.bf16 %v514_v20  ;;  %451 = vmatpush1.bf16.msra.mxu0 %v450_v14  ;;  %466 = vmatpush1.bf16.msra.mxu1 %v450_v14  ;;  %v277_v23 = vsel %vm263_vm2, %v500_v18, %v501_v17 }
  0x86   :  { %v509_v10 = vpop.permute.xlu0 %508  ;;  %v452_v24 = vpack.c.bf16 %v290_v19, %v277_v23 }
  0x87   :  { %v511_v25 = vunpack.i.h.bf16 %v509_v10  ;;  %v510_v26 = vunpack.i.l.bf16 %v509_v10  ;;  %v284_v13 = vsel %vm256_vm1, %v515_v22, %v516_v21 }
  0x88   :  { %v524_v27 = vpop.permute.xlu1 %523  ;;  %453 = vmatprep.subr.bf16.mxu0 %v452_v24  ;;  %462 = vmatprep.subr.bf16.mxu1 %v452_v24 }
  0x89   :  { %v526_v28 = vunpack.i.h.bf16 %v524_v27  ;;  %v525_v29 = vunpack.i.l.bf16 %v524_v27  ;;  %v271_v30 = vsel %vm256_vm1, %v510_v26, %v511_v25 }
  0x8a   :  { %v519_v31 = vpop.permute.xlu0 %518  ;;  %v454_v32 = vpack.c.bf16 %v284_v13, %v271_v30 }
  0x8b   :  { %v521_v33 = vunpack.i.h.bf16 %v519_v31  ;;  %v520_v34 = vunpack.i.l.bf16 %v519_v31  ;;  %v311_v35 = vsel %vm300_vm3, %v525_v29, %v526_v28 }
  0x8c   :  { %v318_v36 = vpop.permute.xlu1 %317  ;;  %455 = vmatpush1.bf16.msra.mxu0 %v454_v32  ;;  %467 = vmatpush1.bf16.msra.mxu1 %v454_v32 }
  0x8d   :  { %v301_v37 = vsel %vm300_vm3, %v520_v34, %v521_v33 }
  0x8e   :  { %v529_v38 = vpop.permute.xlu0 %528  ;;  %v456_v39 = vpack.c.bf16 %v311_v35, %v301_v37 }
  0x8f   :  { %v531_v40 = vunpack.i.h.bf16 %v529_v38  ;;  %v530_v41 = vunpack.i.l.bf16 %v529_v38 }
  0x90   :  { %v314_v42 = vpop.permute.xlu1 %313  ;;  %457 = vmatprep.subr.bf16.mxu0 %v456_v39  ;;  %463 = vmatprep.subr.bf16.mxu1 %v456_v39 }
  0x91   :  { %v294_v43 = vsel %vm232_vm0, %v530_v41, %v480_v57  ;;  %v305_v44 = vsel %vm232_vm0, %v531_v40, %v485_v60  ;;  %v315_v52 = vsel %vm232_vm0, %v314_v42, %v749_v53 }
  0x92   :  { %v320_v45 = vpop.permute.xlu0 %319  ;;  %v458_v46 = vpack.c.bf16 %v305_v44, %v294_v43 }
  0x93   :  { %v321_v47 = vsel %vm300_vm3, %v318_v36, %v320_v45 }
  0x94   :  { %459 = vmatpush1.bf16.msra.mxu0 %v458_v46  ;;  %468 = vmatpush1.bf16.msra.mxu1 %v458_v46  ;;  %v89_v48 = vpop.permute.xlu1 %88 }
  0x95   :  { %360 = vmatprep.subr.mxu0 %v321_v47  ;;  %464 = vmatprep.subr.mxu1 %v321_v47  ;;  %184 = vst.msk [vmem:[%s945_s6 + $0x8] sm:$0xff] %vm182_vm4, %v89_v48 }
  0x96   :  { %v87_v51 = vpop.permute.xlu0 %86 }
  0x97   :  { %183 = vst.msk [vmem:[%s945_s6] sm:$0xff] %vm182_vm4, %v87_v51 }
  0x98   :  { %361 = vmatpush1.msra.mxu0 %v315_v52  ;;  %469 = vmatpush1.msra.mxu1 %v315_v52 }
  0x99   :  { %440 = vmatmul.mubr.msk.f32.vlgmr.msra.gmra.mrb[0].mxu0 %vm337_vm5, %v323_v49  ;;  %441 = vmatmul.mubr.msk.f32.vlgmr.msra.gmra.mrb[0].mxu1 %vm337_vm5, %v324_v50 }
  0x9a   :  { %v91_v54 = vpop.permute.xlu0 %90 }
  0x9b   :  { %185 = vst.msk [vmem:[%s945_s6 + $0x10] sm:$0xff] %vm182_vm4, %v91_v54 }
  0xa5   :  { %v805_v55 = vpop.permute.xlu1 %329 }
  0xa9   :  { %v93_v56 = vpop.permute.xlu1 %92 }
  0xaa   :  { %186 = vst.msk [vmem:[%s945_s6 + $0x18] sm:$0xff] %vm182_vm4, %v93_v56 }
  0xab   :  { %v811_v53 = vpop.permute.xlu0 %334 }
  0xad   :  { %v95_v57 = vpop.permute.xlu1 %94 }
  0xae   :  { %187 = vst.msk [vmem:[%s945_s6 + $0x20] sm:$0xff] %vm182_vm4, %v95_v57 }
  0xaf   :  { %v97_v58 = vpop.permute.xlu0 %96 }
  0xb0   :  { %188 = vst.msk [vmem:[%s945_s6 + $0x28] sm:$0xff] %vm182_vm4, %v97_v58 }
  0xb1   :  { %v99_v59 = vpop.permute.xlu1 %98 }
  0xb2   :  { %189 = vst.msk [vmem:[%s945_s6 + $0x30] sm:$0xff] %vm182_vm4, %v99_v59 }
  0xb3   :  { %v101_v60 = vpop.permute.xlu0 %100 }
  0xb4   :  { %190 = vst.msk [vmem:[%s945_s6 + $0x38] sm:$0xff] %vm182_vm4, %v101_v60 }
  0xb5   :  { %v103_v61 = vpop.permute.xlu1 %102 }
  0xb6   :  { %191 = vst.msk [vmem:[%s945_s6 + $0x40] sm:$0xff] %vm182_vm4, %v103_v61 }
  0xb7   :  { %v105_v62 = vpop.permute.xlu0 %104 }
  0xb8   :  { %192 = vst.msk [vmem:[%s945_s6 + $0x48] sm:$0xff] %vm182_vm4, %v105_v62 }
  0xb9   :  { %v107_v63 = vpop.permute.xlu1 %106 }
  0xba   :  { %193 = vst.msk [vmem:[%s945_s6 + $0x50] sm:$0xff] %vm182_vm4, %v107_v63 }
  0xbb   :  { %v109_v0 = vpop.permute.xlu0 %108 }
  0xbc   :  { %194 = vst.msk [vmem:[%s945_s6 + $0x58] sm:$0xff] %vm182_vm4, %v109_v0 }
  0xbd   :  { %v111_v1 = vpop.permute.xlu1 %110 }
  0xbe   :  { %195 = vst.msk [vmem:[%s945_s6 + $0x60] sm:$0xff] %vm182_vm4, %v111_v1 }
  0xbf   :  { %v113_v2 = vpop.permute.xlu0 %112 }
  0xc0   :  { %196 = vst.msk [vmem:[%s945_s6 + $0x68] sm:$0xff] %vm182_vm4, %v113_v2 }
  0xc1   :  { %v115_v3 = vpop.permute.xlu1 %114 }
  0xc2   :  { %197 = vst.msk [vmem:[%s945_s6 + $0x70] sm:$0xff] %vm182_vm4, %v115_v3 }
  0xc3   :  { %v117_v4 = vpop.permute.xlu0 %116 }
  0xc4   :  { %198 = vst.msk [vmem:[%s945_s6 + $0x78] sm:$0xff] %vm182_vm4, %v117_v4 }
  0xc5   :  { %v119_v5 = vpop.permute.xlu1 %118 }
  0xc6   :  { %199 = vst.msk [vmem:[%s945_s6 + $0x80] sm:$0xff] %vm182_vm4, %v119_v5 }
  0xc7   :  { %v121_v6 = vpop.permute.xlu0 %120 }
  0xc8   :  { %200 = vst.msk [vmem:[%s945_s6 + $0x88] sm:$0xff] %vm182_vm4, %v121_v6 }
  0xc9   :  { %v123_v7 = vpop.permute.xlu1 %122 }
  0xca   :  { %201 = vst.msk [vmem:[%s945_s6 + $0x90] sm:$0xff] %vm182_vm4, %v123_v7 }
  0xcb   :  { %v125_v8 = vpop.permute.xlu0 %124 }
  0xcc   :  { %202 = vst.msk [vmem:[%s945_s6 + $0x98] sm:$0xff] %vm182_vm4, %v125_v8 }
  0xcd   :  { %v127_v9 = vpop.permute.xlu1 %126 }
  0xce   :  { %203 = vst.msk [vmem:[%s945_s6 + $0xa0] sm:$0xff] %vm182_vm4, %v127_v9 }
  0xcf   :  { %v129_v11 = vpop.permute.xlu0 %128 }
  0xd0   :  { %204 = vst.msk [vmem:[%s945_s6 + $0xa8] sm:$0xff] %vm182_vm4, %v129_v11 }
  0xd1   :  { %v131_v12 = vpop.permute.xlu1 %130 }
  0xd2   :  { %205 = vst.msk [vmem:[%s945_s6 + $0xb0] sm:$0xff] %vm182_vm4, %v131_v12 }
  0xd3   :  { %v133_v14 = vpop.permute.xlu0 %132 }
  0xd4   :  { %206 = vst.msk [vmem:[%s945_s6 + $0xb8] sm:$0xff] %vm182_vm4, %v133_v14 }
  0xd5   :  { %v135_v15 = vpop.permute.xlu1 %134 }
  0xd6   :  { %207 = vst.msk [vmem:[%s945_s6 + $0xc0] sm:$0xff] %vm182_vm4, %v135_v15 }
  0xd7   :  { %v137_v16 = vpop.permute.xlu0 %136 }
  0xd8   :  { %208 = vst.msk [vmem:[%s945_s6 + $0xc8] sm:$0xff] %vm182_vm4, %v137_v16 }
  0xd9   :  { %v139_v17 = vpop.permute.xlu1 %138 }
  0xda   :  { %209 = vst.msk [vmem:[%s945_s6 + $0xd0] sm:$0xff] %vm182_vm4, %v139_v17 }
  0xdb   :  { %v141_v18 = vpop.permute.xlu0 %140 }
  0xdc   :  { %210 = vst.msk [vmem:[%s945_s6 + $0xd8] sm:$0xff] %vm182_vm4, %v141_v18 }
  0xdd   :  { %v143_v19 = vpop.permute.xlu1 %142 }
  0xde   :  { %211 = vst.msk [vmem:[%s945_s6 + $0xe0] sm:$0xff] %vm182_vm4, %v143_v19 }
  0xdf   :  { %v145_v20 = vpop.permute.xlu0 %144 }
  0xe0   :  { %212 = vst.msk [vmem:[%s945_s6 + $0xe8] sm:$0xff] %vm182_vm4, %v145_v20 }
  0xe1   :  { %v147_v21 = vpop.permute.xlu1 %146 }
  0xe2   :  { %213 = vst.msk [vmem:[%s945_s6 + $0xf0] sm:$0xff] %vm182_vm4, %v147_v21 }
  0xe3   :  { %v149_v22 = vpop.permute.xlu0 %148 }
  0xe4   :  { %214 = vst.msk [vmem:[%s945_s6 + $0xf8] sm:$0xff] %vm182_vm4, %v149_v22 }
 0x16c   :  { %v410_v23 = vpop.f32.mrb[0].mxu0  ;;  %v416_v10 = vpop.f32.mrb[0].mxu1 }
 0x16d   :  { %v411_v24 = vadd.f32 %v410_v23, %v805_v55  ;;  %v417_v25 = vadd.f32 %v416_v10, %v811_v53  ;;  %v412_v26 = vpop.f32.mrb[1].mxu0  ;;  %v418_v13 = vpop.f32.mrb[1].mxu1 }
 0x16e   :  { %v413_v27 = vadd.f32 %v412_v26, %v805_v55  ;;  %v419_v28 = vadd.f32 %v418_v13, %v811_v53 }
 0x16f   :  { %421 = vst [vmem:[%s947_s5] sm:$0xff] %v411_v24  ;;  %422 = vst [vmem:[%s947_s5 + $0x8] sm:$0xff] %v417_v25 }
 0x170   :  { %442 = vst [vmem:[%s947_s5 + $0x10] sm:$0xff] %v413_v27  ;;  %443 = vst [vmem:[%s947_s5 + $0x18] sm:$0xff] %v419_v28 }

</bundles_post_ra>
